<compile_context>
chip_gen: v6e
topology: v6e:2x2x1
jax: 0.10.0
libtpu: 0.0.40
codegen_flags: <defaults>
</compile_context>

<pallas_src>
import functools
import math

import jax
import jax.numpy as jnp
from jax.experimental import pallas as pl
from jax.experimental.pallas import tpu as pltpu

NEG_SLOPE = 0.2
SCALE = math.sqrt(2.0)
POS_GAIN = SCALE                # x >= 0 branch
NEG_GAIN = NEG_SLOPE * SCALE    # x <  0 branch

LANE = 128


def _device_defaults():
    """(block_bytes, vmem_limit_bytes) tuned per TPU generation."""
    try:
        kind = jax.devices()[0].device_kind.lower()
    except Exception:  # pragma: no cover - e.g. interpret mode / no backend yet
        kind = ""
    if "v7" in kind:
        # 8 MiB blocks -> 4 * 8 MiB = 32 MiB scoped (double-buffered in + out),
        # half of v7x's 64 MiB physical VMEM.
        return 8 * 1024 * 1024, 48 << 20
    # v5e / v6e: 2 MiB blocks are already at the HBM roofline plateau and
    # 4 * 2 MiB = 8 MiB scoped stays far below even v5e's 16 MiB default cap.
    return 2 * 1024 * 1024, 32 << 20


_BLOCK_BYTES, _VMEM_LIMIT = _device_defaults()


def _min_sublanes(dtype) -> int:
    # Packed dtypes need taller minimum tiles: (8,128) f32, (16,128) bf16, (32,128) int8/fp8.
    return {4: 8, 2: 16, 1: 32}.get(jnp.dtype(dtype).itemsize, 8)


def _round_up(v: int, m: int) -> int:
    return ((v + m - 1) // m) * m


def _leaky_relu_kernel(x_ref, o_ref):
    x = x_ref[...]
    # One select + one multiply per element (cmp/vsel/vmul); compute is hidden
    # under the DMAs anyway, this just keeps VALU/vreg pressure minimal.
    gain = jnp.where(x >= 0, POS_GAIN, NEG_GAIN).astype(x.dtype)
    o_ref[...] = (x * gain).astype(o_ref.dtype)


def _run_kernel_2d(flat, dtype, alias_output: bool):
    """Run the kernel on a flat, 128-aligned array; returns a flat array."""
    n = flat.shape[0]                      # multiple of LANE
    itemsize = jnp.dtype(dtype).itemsize
    min_rows = _min_sublanes(dtype)

    # Widest lane-dense last dim (multiple of 128) that divides the total:
    # wide unmasked vst + fewer/larger DMA descriptors.
    width = LANE
    for cand in (8192, 4096, 2048, 1024, 512, 256):
        if n % cand == 0:
            width = cand
            break
    rows = n // width
    x2d = flat.reshape(rows, width)

    # Generation-aware block size, rounded to the dtype's sublane minimum.
    block_rows = max(min_rows, _BLOCK_BYTES // (width * itemsize))
    block_rows = (block_rows // min_rows) * min_rows
    block_rows = min(block_rows, rows)

    num_blocks = pl.cdiv(rows, block_rows)
    if num_blocks == 1 and rows >= 2 * min_rows:
        # Single-block slab: split into >= 4 (even) blocks when possible so
        # each v7x TensorCore gets >= 2 pipelined steps (writeback of step i
        # hides under the read of step i+1).
        want = 4 if rows >= 4 * min_rows else 2
        block_rows = _round_up(pl.cdiv(rows, want), min_rows)
        num_blocks = pl.cdiv(rows, block_rows)
    elif num_blocks > 1 and num_blocks % 2 == 1:
        # Prefer an even total block count so the two v7x cores stay balanced.
        cand_rows = _round_up(pl.cdiv(rows, num_blocks + 1), min_rows)
        if cand_rows >= min_rows and pl.cdiv(rows, cand_rows) % 2 == 0:
            block_rows = cand_rows
            num_blocks = pl.cdiv(rows, cand_rows)

    extra = {}
    if alias_output:
        # Output written in place into the (donated) input HBM buffer.
        extra["input_output_aliases"] = {0: 0}

    out2d = pl.pallas_call(
        _leaky_relu_kernel,
        out_shape=jax.ShapeDtypeStruct((rows, width), dtype),
        grid_spec=pl.GridSpec(
            grid=(num_blocks,),  # ragged last block is masked by Pallas
            in_specs=[pl.BlockSpec((block_rows, width), lambda i: (i, 0))],
            out_specs=pl.BlockSpec((block_rows, width), lambda i: (i, 0)),
        ),
        compiler_params=pltpu.CompilerParams(
            dimension_semantics=("parallel",),
            vmem_limit_bytes=_VMEM_LIMIT,
        ),
        **extra,
    )(x2d)
    return out2d.reshape(-1)


def _forward(x: jax.Array, *, alias_output: bool) -> jax.Array:
    """Elementwise leaky_relu(x, 0.2) * sqrt(2) for floating-point inputs."""
    dtype = x.dtype
    if not jnp.issubdtype(dtype, jnp.floating):
        raise TypeError(
            f"scaled_leaky_relu expects a floating-point input, got {dtype}")
    orig_shape = x.shape
    n = x.size
    if n == 0:
        return x

    flat = x.reshape(-1)
    n_bulk = (n // LANE) * LANE

    if n_bulk == 0:
        # Fewer than 128 elements: not worth a kernel launch.
        return (flat * jnp.where(flat >= 0, POS_GAIN, NEG_GAIN).astype(dtype)
                ).reshape(orig_shape)

    if n_bulk == n:
        # Hot path (StyleGAN NCHW activations): copy-free, kernel only.
        out_flat = _run_kernel_2d(flat, dtype, alias_output)
    else:
        # Unaligned tail (< 128 elems): kernel on the aligned bulk, tiny XLA
        # op on the tail.  Avoids padding + trimming the whole array.
        bulk_out = _run_kernel_2d(flat[:n_bulk], dtype, alias_output)
        tail = flat[n_bulk:]
        tail_out = tail * jnp.where(tail >= 0, POS_GAIN, NEG_GAIN).astype(dtype)
        out_flat = jnp.concatenate([bulk_out, tail_out])

    return out_flat.reshape(orig_shape)


# Non-donating variant: input stays valid after the call.
scaled_leaky_relu = jax.jit(functools.partial(_forward, alias_output=False))

# "In-place" variant: donates the input and aliases the kernel output onto the
# same HBM buffer (mirrors the PyTorch module's inplace=True).
scaled_leaky_relu_ = jax.jit(
    functools.partial(_forward, alias_output=True), donate_argnums=(0,))


def _reference(x):
    return jnp.where(x >= 0, x, x * NEG_SLOPE) * SCALE


if __name__ == "__main__":
    key = jax.random.PRNGKey(0)
    # NCHW input, small shape consistent with the module: batch=2, channels=4, 16x16.
    x = jax.random.normal(key, (2, 4, 16, 16), dtype=jnp.float32)
    ref = _reference(x)

    out = jax.block_until_ready(scaled_leaky_relu(x))
    assert out.shape == x.shape
    assert out.dtype == x.dtype
    assert jnp.allclose(out, ref, atol=1e-6, rtol=1e-5)

    # Donating / in-place variant (input buffer is reused for the output).
    x2 = jax.random.normal(key, (2, 4, 16, 16), dtype=jnp.float32)
    out2 = jax.block_until_ready(scaled_leaky_relu_(x2))
    assert jnp.allclose(out2, ref, atol=1e-6, rtol=1e-5)

    print("KERNEL_OK")
</pallas_src>

<mosaic_0001>
module attributes {stable_mosaic.version = 11 : i64} {
  func.func @_leaky_relu_kernel(%arg0: i32, %arg1: memref<1x2048xf32, #tpu.memory_space<vmem>>, %arg2: memref<1x2048xf32, #tpu.memory_space<vmem>>) attributes {dimension_semantics = [#tpu.dimension_semantics<parallel>], iteration_bounds = array<i64: 1>, scalar_prefetch = 0 : i64, scratch_operands = 0 : i64, tpu.core_type = #tpu.core_type<tc>, window_params = [{transform_indices = @transform_0, window_bounds = array<i64: 1, 2048>}, {transform_indices = @transform_1, window_bounds = array<i64: 1, 2048>}]} {
    %c0 = arith.constant 0 : index
    %c0_0 = arith.constant 0 : index
    %0 = vector.load %arg1[%c0, %c0_0] : memref<1x2048xf32, #tpu.memory_space<vmem>>, vector<1x2048xf32>
    %cst = arith.constant 0.000000e+00 : f32
    %1 = vector.broadcast %cst : f32 to vector<1x2048xf32>
    %2 = arith.cmpf oge, %0, %1 : vector<1x2048xf32>
    %cst_1 = arith.constant 1.41421354 : f32
    %cst_2 = arith.constant 0.282842726 : f32
    %3 = vector.broadcast %cst_1 : f32 to vector<1x2048xf32>
    %4 = vector.broadcast %cst_2 : f32 to vector<1x2048xf32>
    %5 = arith.select %2, %3, %4 : vector<1x2048xi1>, vector<1x2048xf32>
    %6 = arith.mulf %0, %5 : vector<1x2048xf32>
    %c0_3 = arith.constant 0 : index
    %c0_4 = arith.constant 0 : index
    %7 = vector.load %arg2[%c0_3, %c0_4] : memref<1x2048xf32, #tpu.memory_space<vmem>>, vector<1x2048xf32>
    tpu.vector_store %arg2[%c0_3, %c0_4], %6 {strides = array<i32>} : memref<1x2048xf32, #tpu.memory_space<vmem>>, vector<1x2048xf32>,
    return
  }
  func.func @transform_0(%arg0: i32) -> (i32, i32) {
    %c0_i32 = arith.constant 0 : i32
    %c0_i32_0 = arith.constant 0 : i32
    return %arg0, %c0_i32 : i32, i32
  }
  func.func @transform_1(%arg0: i32) -> (i32, i32) {
    %c0_i32 = arith.constant 0 : i32
    %c0_i32_0 = arith.constant 0 : i32
    return %arg0, %c0_i32 : i32, i32
  }
}

</mosaic_0001>

<bundles_post_ra>
// kernel: _forward.1
= control target key start
LH: loop header
LB: loop body
LE: loop exit
PB: predicated region body
PF: predicated region fallthrough
CT: control target
= control target key end

     0   :  { %v23_v2 = vmov 0.28284273   ;;  %s46_s0 = inlined_call_operand.vmem [shape: f32[1,2048], index: 0, kind: input, shape index: {}]   ;;  %s47_s1 = inlined_call_operand.vmem [shape: f32[1,2048], index: 1, kind: output, shape index: {}]  }
   0x1   :  { %v8_v0 = vld [vmem:[%s46_s0] sm:$0xff]  ;;  %v9_v1 = vld [vmem:[%s46_s0 + $0x8] sm:$0xff] }
   0x2   :  { %vm10_vm0 = vcmp.ge.f32.partialorder %v8_v0, 0.0  ;;  %vm11_vm1 = vcmp.ge.f32.partialorder %v9_v1, 0.0 }
   0x3   :  { %v12_v3 = vsel %vm10_vm0, 1.4142135, %v23_v2  ;;  %v13_v4 = vsel %vm11_vm1, 1.4142135, %v23_v2 }
   0x4   :  { %v14_v5 = vmul.f32 %v12_v3, %v8_v0  ;;  %v15_v6 = vmul.f32 %v13_v4, %v9_v1 }
   0x6   :  { %16 = vst [vmem:[%s47_s1] sm:$0xff] %v14_v5  ;;  %17 = vst [vmem:[%s47_s1 + $0x8] sm:$0xff] %v15_v6 }

</bundles_post_ra>
